<compile_context>
chip_gen: v7x
topology: tpu7x:2x2x1
jax: 0.10.0
libtpu: 0.0.40
codegen_flags: <defaults>
</compile_context>

<pallas_src>
import functools
import itertools

import numpy as np
import jax
import jax.numpy as jnp
from jax.experimental import pallas as pl
from jax.experimental.pallas import tpu as pltpu


# ----------------------------------------------------------------------------
# Helpers
# ----------------------------------------------------------------------------
def _round_up(x, m):
    return ((x + m - 1) // m) * m


_DIRECT_X_BUDGET = 4 * 1024 * 1024   # per-image flattened activation window (bytes, bf16)
_DIRECT_W_BUDGET = 8 * 1024 * 1024   # one (k*k, Cin, tn) weight tile (bytes, bf16)


# ----------------------------------------------------------------------------
# Fused GEMM  ->  out = [relu]( (A @ B) + bias [+ residual] )   (bf16 in/out, f32 acc)
# ----------------------------------------------------------------------------
def _gemm_bias_act_kernel(a_ref, b_ref, bias_ref, *rest, relu, has_res):
    if has_res:
        r_ref, o_ref, acc_ref = rest
    else:
        o_ref, acc_ref = rest

    @pl.when(pl.program_id(2) == 0)
    def _init():
        acc_ref[...] = jnp.zeros_like(acc_ref)

    acc_ref[...] += jnp.dot(a_ref[...], b_ref[...],
                            preferred_element_type=jnp.float32)

    @pl.when(pl.program_id(2) == pl.num_programs(2) - 1)
    def _fin():
        y = acc_ref[...] + bias_ref[...]
        if has_res:
            y = y + r_ref[...].astype(jnp.float32)
        if relu:
            y = jnp.maximum(y, 0.0)
        o_ref[...] = y.astype(o_ref.dtype)


def _gemm_bias_act(a, b, bias, residual, relu):
    """A:(M,K) bf16, B:(K,Nw) bf16 (Nw already multiple of 128), bias:(1,Nw) f32."""
    M, K = a.shape
    _, Nw = b.shape

    tm = min(512, _round_up(M, 16))
    tn = 256 if Nw >= 512 else 128          # keep >=2 N blocks when possible (megacore)
    tk = min(2048, _round_up(K, 128))       # single K step for every GEMM in this net
    Mp, Np2, Kp = _round_up(M, tm), _round_up(Nw, tn), _round_up(K, tk)

    a_p = jnp.pad(a, ((0, Mp - M), (0, Kp - K)))
    b_p = jnp.pad(b, ((0, Kp - K), (0, Np2 - Nw)))
    bias_p = jnp.pad(bias, ((0, 0), (0, Np2 - Nw)))

    has_res = residual is not None
    in_specs = [
        pl.BlockSpec((tm, tk), lambda i, j, kk: (i, kk)),
        pl.BlockSpec((tk, tn), lambda i, j, kk: (kk, j)),
        pl.BlockSpec((1, tn), lambda i, j, kk: (0, j)),
    ]
    args = [a_p, b_p, bias_p]
    if has_res:
        r_p = jnp.pad(residual.astype(jnp.bfloat16),
                      ((0, Mp - M), (0, Np2 - residual.shape[1])))
        in_specs.append(pl.BlockSpec((tm, tn), lambda i, j, kk: (i, j)))
        args.append(r_p)

    out = pl.pallas_call(
        functools.partial(_gemm_bias_act_kernel, relu=bool(relu), has_res=has_res),
        out_shape=jax.ShapeDtypeStruct((Mp, Np2), jnp.bfloat16),
        grid=(Mp // tm, Np2 // tn, Kp // tk),
        in_specs=in_specs,
        out_specs=pl.BlockSpec((tm, tn), lambda i, j, kk: (i, j)),
        scratch_shapes=[pltpu.VMEM((tm, tn), jnp.float32)],
        compiler_params=pltpu.CompilerParams(
            dimension_semantics=("parallel", "parallel", "arbitrary")),
    )(*args)
    return out


# ----------------------------------------------------------------------------
# Direct stride-1 conv: padded activation (row-flattened) resident in VMEM,
# k*k tap GEMMs accumulated in-kernel -> no im2col HBM round trip.
# ----------------------------------------------------------------------------
def _direct_conv_kernel(x_ref, w_ref, b_ref, o_ref, *, tap_ids, offs, m_out, relu):
    acc = None
    for t, off in zip(tap_ids, offs):
        a = x_ref[0, off:off + m_out, :]                      # (m_out, Cin) bf16
        d = jnp.dot(a, w_ref[t], preferred_element_type=jnp.float32)
        acc = d if acc is None else acc + d
    y = acc + b_ref[...]
    if relu:
        y = jnp.maximum(y, 0.0)
    o_ref[0] = y.astype(o_ref.dtype)


@functools.partial(jax.jit,
                   static_argnames=("k", "dilation", "padding", "relu", "taps", "cout"))
def _conv_direct_impl(x, w_taps, bias, *, k, dilation, padding, relu, taps, cout):
    N, H, W, C = x.shape
    d, p = dilation, padding
    Ho = H + 2 * p - d * (k - 1)
    Wo = W + 2 * p - d * (k - 1)
    Hp, Wp = H + 2 * p, W + 2 * p
    m_out = Ho * Wp                            # compute Wp-wide rows, discard the extras

    xb = jnp.pad(x.astype(jnp.bfloat16), ((0, 0), (p, p), (p, p), (0, 0)))
    xf = xb.reshape(N, Hp * Wp, C)
    r_need = (k - 1) * d * (Wp + 1) + m_out
    if r_need > Hp * Wp:
        xf = jnp.pad(xf, ((0, 0), (0, r_need - Hp * Wp), (0, 0)))
    R = xf.shape[1]

    tap_ids = tuple(i * k + j for (i, j) in taps)
    offs = tuple((i * d) * Wp + j * d for (i, j) in taps)

    k2, _, Coutp = w_taps.shape
    tn = 256 if Coutp >= 512 else 128

    out = pl.pallas_call(
        functools.partial(_direct_conv_kernel, tap_ids=tap_ids, offs=offs,
                          m_out=m_out, relu=bool(relu)),
        out_shape=jax.ShapeDtypeStruct((N, m_out, Coutp), jnp.bfloat16),
        grid=(N, Coutp // tn),
        in_specs=[
            pl.BlockSpec((1, R, C), lambda n, c: (n, 0, 0)),
            pl.BlockSpec((k2, C, tn), lambda n, c: (0, 0, c)),
            pl.BlockSpec((1, tn), lambda n, c: (0, c)),
        ],
        out_specs=pl.BlockSpec((1, m_out, tn), lambda n, c: (n, 0, c)),
        compiler_params=pltpu.CompilerParams(
            dimension_semantics=("parallel", "parallel")),
    )(xf, w_taps, bias)

    return out.reshape(N, Ho, Wp, Coutp)[:, :, :Wo, :cout]


# ----------------------------------------------------------------------------
# Fallback conv path: 1x1 reshape-GEMM, or im2col (only the 3 stride-2 convs use it)
# ----------------------------------------------------------------------------
@functools.partial(jax.jit,
                   static_argnames=("k", "stride", "dilation", "padding", "relu", "cout"))
def _conv_gemm_impl(x, w, bias, residual, *, k, stride, dilation, padding, relu, cout):
    N, H, W, C = x.shape
    Ho = (H + 2 * padding - dilation * (k - 1) - 1) // stride + 1
    Wo = (W + 2 * padding - dilation * (k - 1) - 1) // stride + 1
    xb = x.astype(jnp.bfloat16)

    if k == 1 and padding == 0:
        if stride != 1:
            xb = xb[:, ::stride, ::stride, :]
        patches = xb.reshape(N * Ho * Wo, C)
    else:
        # TODO(synk): only the 3 stride-2 convs in this network take this im2col path;
        # a strided-tap manual-DMA kernel would remove this last HBM materialization.
        xp = jnp.pad(xb, ((0, 0), (padding, padding), (padding, padding), (0, 0)))
        cols = []
        for i in range(k):
            for j in range(k):
                hs, ws = i * dilation, j * dilation
                patch = jax.lax.slice(
                    xp, (0, hs, ws, 0),
                    (N, hs + (Ho - 1) * stride + 1, ws + (Wo - 1) * stride + 1, C),
                    (1, stride, stride, 1))
                cols.append(patch)
        patches = (cols[0] if len(cols) == 1
                   else jnp.concatenate(cols, axis=-1)).reshape(N * Ho * Wo, k * k * C)

    w2 = w.reshape(-1, w.shape[-1])
    res2d = None if residual is None else residual.reshape(N * Ho * Wo, -1)
    out = _gemm_bias_act(patches, w2, bias, res2d, relu)
    return out[:N * Ho * Wo, :cout].reshape(N, Ho, Wo, cout)


# ----------------------------------------------------------------------------
# Conv + folded-BN (+residual, +ReLU) dispatcher
# ----------------------------------------------------------------------------
def apply_conv_bn(x, p, *, stride=1, dilation=1, padding=0, relu=True, residual=None):
    k, cout = p["k"], p["cout"]
    N, H, W, C = x.shape
    Ho = (H + 2 * padding - dilation * (k - 1) - 1) // stride + 1
    Wo = (W + 2 * padding - dilation * (k - 1) - 1) // stride + 1

    if k == 1:
        return _conv_gemm_impl(x, p["w_gemm"], p["bias"], residual,
                               k=1, stride=stride, dilation=1, padding=0,
                               relu=relu, cout=cout)

    # Exact tap filter: a tap whose reads fall entirely inside the zero padding
    # contributes exactly zero and is dropped (ASPP rates 12/24/36 at small maps).
    def _ok(i, in_n, out_n):
        lo = i * dilation
        return (lo <= padding + in_n - 1) and (lo + stride * (out_n - 1) >= padding)

    taps = tuple((i, j) for i in range(k) for j in range(k)
                 if _ok(i, H, Ho) and _ok(j, W, Wo))

    if len(taps) == 1:
        (i, j) = taps[0]
        r0, c0 = i * dilation - padding, j * dilation - padding
        if (r0 >= 0 and c0 >= 0 and
                r0 + stride * (Ho - 1) < H and c0 + stride * (Wo - 1) < W):
            # Conv collapses to a 1x1 conv on an (optionally strided) window of x.
            src = jax.lax.slice(
                x, (0, r0, c0, 0),
                (N, r0 + stride * (Ho - 1) + 1, c0 + stride * (Wo - 1) + 1, C),
                (1, stride, stride, 1))
            w1 = p["w_taps"][i * k + j]
            return _conv_gemm_impl(src, w1, p["bias"], residual,
                                   k=1, stride=1, dilation=1, padding=0,
                                   relu=relu, cout=cout)

    if stride == 1 and residual is None:
        Hp, Wp = H + 2 * padding, W + 2 * padding
        r_need = (k - 1) * dilation * (Wp + 1) + Ho * Wp
        coutp = p["w_taps"].shape[-1]
        tn = 256 if coutp >= 512 else 128
        if (r_need * C * 2 <= _DIRECT_X_BUDGET and
                k * k * C * tn * 2 <= _DIRECT_W_BUDGET):
            # TODO(synk): at very large feature maps this window exceeds the VMEM budget;
            # an M-row-tiled variant (manual DMA of overlapping row windows) would be
            # needed there — we fall back to im2col instead.
            return _conv_direct_impl(x, p["w_taps"], p["bias"],
                                     k=k, dilation=dilation, padding=padding,
                                     relu=relu, taps=taps, cout=cout)

    return _conv_gemm_impl(x, p["w_taps"], p["bias"], residual,
                           k=k, stride=stride, dilation=dilation, padding=padding,
                           relu=relu, cout=cout)


# ----------------------------------------------------------------------------
# MaxPool / global-avg-pool: left to XLA (pure memory-bound reductions).
# ----------------------------------------------------------------------------
@functools.partial(jax.jit, static_argnames=("ksize", "stride", "padding"))
def max_pool2d(x, *, ksize=3, stride=2, padding=1):
    init = jnp.array(-jnp.inf, dtype=x.dtype)
    return jax.lax.reduce_window(
        x, init, jax.lax.max,
        window_dimensions=(1, ksize, ksize, 1),
        window_strides=(1, stride, stride, 1),
        padding=((0, 0), (padding, padding), (padding, padding), (0, 0)))


def global_avg_pool(x):  # [N,H,W,C] -> [N,1,1,C]  (f32 mean)
    return jnp.mean(x.astype(jnp.float32), axis=(1, 2), keepdims=True)


# ----------------------------------------------------------------------------
# Bilinear upsample (align_corners=False) as a tiled 2-tap Pallas lerp
# ----------------------------------------------------------------------------
def _lerp_kernel(a_ref, b_ref, t_ref, o_ref):
    t = t_ref[...]                       # (tr, 1) per-row interpolation weight
    o_ref[...] = a_ref[...] + (b_ref[...] - a_ref[...]) * t


def _lerp_rows(a, b, t):
    R, Ccols = a.shape
    tr = 256 if R >= 256 else _round_up(R, 8)
    tc = 1024 if Ccols >= 1024 else _round_up(Ccols, 128)
    Rp, Cp = _round_up(R, tr), _round_up(Ccols, tc)
    a_p = jnp.pad(a, ((0, Rp - R), (0, Cp - Ccols)))
    b_p = jnp.pad(b, ((0, Rp - R), (0, Cp - Ccols)))
    t_p = jnp.pad(t, ((0, Rp - R), (0, 0)))
    out = pl.pallas_call(
        _lerp_kernel,
        out_shape=jax.ShapeDtypeStruct((Rp, Cp), jnp.float32),
        grid=(Rp // tr, Cp // tc),
        in_specs=[
            pl.BlockSpec((tr, tc), lambda i, j: (i, j)),
            pl.BlockSpec((tr, tc), lambda i, j: (i, j)),
            pl.BlockSpec((tr, 1), lambda i, j: (i, 0)),
        ],
        out_specs=pl.BlockSpec((tr, tc), lambda i, j: (i, j)),
        compiler_params=pltpu.CompilerParams(
            dimension_semantics=("parallel", "parallel")),
    )(a_p, b_p, t_p)
    return out[:R, :Ccols]


def _bilinear_indices(in_size, out_size):
    scale = in_size / out_size
    d = np.arange(out_size, dtype=np.float64)
    src = np.maximum((d + 0.5) * scale - 0.5, 0.0)
    i0 = np.minimum(np.floor(src).astype(np.int64), in_size - 1)
    i1 = np.minimum(i0 + 1, in_size - 1)
    lam = (src - i0).astype(np.float32)
    return (jnp.asarray(i0, jnp.int32), jnp.asarray(i1, jnp.int32),
            jnp.asarray(lam, jnp.float32))


@functools.partial(jax.jit, static_argnames=("out_h", "out_w"))
def upsample_bilinear(x, *, out_h, out_w):
    # TODO(synk): fuse the row/col gathers into the lerp kernel via scalar-prefetched
    # index vectors (PrefetchScalarGridSpec) to cut the upsample HBM traffic ~3x.
    x = x.astype(jnp.float32)
    N, h, w, C = x.shape
    if h == out_h and w == out_w:
        return x
    h0, h1, lh = _bilinear_indices(h, out_h)
    w0, w1, lw = _bilinear_indices(w, out_w)
    a = jnp.take(x, h0, axis=1).reshape(N * out_h, w * C)
    b = jnp.take(x, h1, axis=1).reshape(N * out_h, w * C)
    t = jnp.tile(lh, N)[:, None]
    y = _lerp_rows(a, b, t).reshape(N, out_h, w, C)
    a = jnp.take(y, w0, axis=2).reshape(N * out_h * out_w, C)
    b = jnp.take(y, w1, axis=2).reshape(N * out_h * out_w, C)
    t = jnp.tile(lw, N * out_h)[:, None]
    z = _lerp_rows(a, b, t).reshape(N, out_h, out_w, C)
    return z


# ----------------------------------------------------------------------------
# Deterministic synthetic parameters (shapes of deeplabv3_resnet101)
# ----------------------------------------------------------------------------
_BASE_KEY = jax.random.PRNGKey(0)
_PARAM_IDX = itertools.count()


def make_conv_bn(cin, cout, k):
    kw_ = jax.random.fold_in(_BASE_KEY, next(_PARAM_IDX))
    kg = jax.random.fold_in(_BASE_KEY, next(_PARAM_IDX))
    kb = jax.random.fold_in(_BASE_KEY, next(_PARAM_IDX))
    fan_in = k * k * cin
    w = jax.random.normal(kw_, (k, k, cin, cout), jnp.float32) * np.sqrt(2.0 / fan_in)
    gamma = 1.0 + 0.05 * jax.random.normal(kg, (cout,), jnp.float32)
    beta = 0.02 * jax.random.normal(kb, (cout,), jnp.float32)
    running_mean = jnp.zeros((cout,), jnp.float32)
    running_var = jnp.ones((cout,), jnp.float32)
    eps = 1e-5
    scale = gamma * jax.lax.rsqrt(running_var + eps)
    bias = beta - running_mean * scale
    # Fold the BN scale into the weight columns (f32), pad Cout to a lane-dense
    # multiple of 128 with zeros (bias padded with zeros keeps padded cols exactly 0).
    w_f = w * scale
    coutp = _round_up(cout, 128)
    w_f = jnp.pad(w_f, ((0, 0), (0, 0), (0, 0), (0, coutp - cout)))
    bias_p = jnp.pad(bias, (0, coutp - cout)).reshape(1, coutp)
    d = {"k": k, "cin": cin, "cout": cout, "bias": bias_p}
    if k == 1:
        d["w_gemm"] = w_f.reshape(cin, coutp).astype(jnp.bfloat16)
    else:
        d["w_taps"] = w_f.reshape(k * k, cin, coutp).astype(jnp.bfloat16)
    return d


def _make_layer(state, planes, blocks, stride, dilate):
    expansion = 4
    prev_dilation = state["dilation"]
    if dilate:                       # replace_stride_with_dilation
        state["dilation"] *= stride
        stride = 1
    inplanes = state["inplanes"]
    layer = []
    blk = {"conv1": make_conv_bn(inplanes, planes, 1),
           "conv2": make_conv_bn(planes, planes, 3),
           "conv3": make_conv_bn(planes, planes * expansion, 1)}
    if stride != 1 or inplanes != planes * expansion:
        blk["downsample"] = make_conv_bn(inplanes, planes * expansion, 1)
    layer.append((blk, stride, prev_dilation))
    inplanes = planes * expansion
    for _ in range(1, blocks):
        blk = {"conv1": make_conv_bn(inplanes, planes, 1),
               "conv2": make_conv_bn(planes, planes, 3),
               "conv3": make_conv_bn(planes, planes * expansion, 1)}
        layer.append((blk, 1, state["dilation"]))
    state["inplanes"] = inplanes
    return layer


def _build_params():
    # TODO(synk): synthetic He-init weights, not the pretrained torchvision checkpoint.
    params = {"stem": make_conv_bn(3, 64, 7)}
    state = {"dilation": 1, "inplanes": 64}
    # ResNet-101: blocks [3, 4, 23, 3], replace_stride_with_dilation=[False, True, True]
    params["layer1"] = _make_layer(state, 64, 3, stride=1, dilate=False)
    params["layer2"] = _make_layer(state, 128, 4, stride=2, dilate=False)
    params["layer3"] = _make_layer(state, 256, 23, stride=2, dilate=True)
    params["layer4"] = _make_layer(state, 512, 3, stride=2, dilate=True)
    # DeepLabHead: ASPP(2048, [12, 24, 36]) + 3x3 conv + BN + ReLU (+ Identity)
    aspp = {"b0": make_conv_bn(2048, 256, 1),
            "b1": make_conv_bn(2048, 256, 3),
            "b2": make_conv_bn(2048, 256, 3),
            "b3": make_conv_bn(2048, 256, 3),
            "pool": make_conv_bn(2048, 256, 1),
            "project": make_conv_bn(5 * 256, 256, 1)}
    params["aspp"] = aspp
    params["head"] = make_conv_bn(256, 256, 3)
    # classifier[-1] (Conv2d(256, num_classes, 1)) was replaced with nn.Identity()
    return params


# ----------------------------------------------------------------------------
# Model forward
# ----------------------------------------------------------------------------
def bottleneck(x, blk, stride, dilation):
    if "downsample" in blk:
        identity = apply_conv_bn(x, blk["downsample"], stride=stride, relu=False)
    else:
        identity = x
    out = apply_conv_bn(x, blk["conv1"], relu=True)
    out = apply_conv_bn(out, blk["conv2"], stride=stride, dilation=dilation,
                        padding=dilation, relu=True)
    # conv3 + BN + residual add + ReLU fused in one Pallas GEMM
    out = apply_conv_bn(out, blk["conv3"], relu=True, residual=identity)
    return out


def deeplab_head(x, params):
    aspp = params["aspp"]
    N, H, W, C = x.shape
    branches = [apply_conv_bn(x, aspp["b0"], relu=True)]
    for name, rate in (("b1", 12), ("b2", 24), ("b3", 36)):
        branches.append(apply_conv_bn(x, aspp[name], dilation=rate, padding=rate, relu=True))
    pooled = global_avg_pool(x)                                       # [N,1,1,2048]
    pooled = apply_conv_bn(pooled, aspp["pool"], relu=True)           # [N,1,1,256]
    # bilinear upsample from 1x1 (align_corners=False) == broadcast
    branches.append(jnp.broadcast_to(pooled, (N, H, W, pooled.shape[-1])))
    y = jnp.concatenate(branches, axis=-1)                            # [N,H,W,1280]
    y = apply_conv_bn(y, aspp["project"], relu=True)
    # Dropout(p=0.5): inference-mode identity.
    # TODO(synk): train-mode BatchNorm batch-stats and Dropout sampling are not replicated.
    y = apply_conv_bn(y, params["head"], padding=1, relu=True)
    # classifier[-1] replaced by nn.Identity() -> 256-channel features
    return y


class DeeplabV3EncoderPallas:
    """Pallas-TPU equivalent of DeeplabV3Encoder.forward (returns deeplab(x)['out'])."""

    def __init__(self, in_dim=3, out_dim=256, **kwargs):
        assert in_dim == 3, "DeepLabV3-ResNet101 backbone expects 3 input channels"
        self.params = _build_params()

    def __call__(self, x_nchw):
        p = self.params
        N, C, H, W = x_nchw.shape
        x = jnp.transpose(x_nchw, (0, 2, 3, 1)).astype(jnp.float32)  # NCHW -> NHWC
        # ResNet-101 backbone (output stride 8)
        x = apply_conv_bn(x, p["stem"], stride=2, padding=3, relu=True)
        x = max_pool2d(x, ksize=3, stride=2, padding=1)
        for layer in ("layer1", "layer2", "layer3", "layer4"):
            for blk, stride, dil in p[layer]:
                x = bottleneck(x, blk, stride, dil)
        # DeepLab head (ASPP + conv) then bilinear upsample back to input size
        x = deeplab_head(x, p)
        x = upsample_bilinear(x, out_h=H, out_w=W)
        return jnp.transpose(x, (0, 3, 1, 2))                        # NHWC -> NCHW


# ----------------------------------------------------------------------------
if __name__ == "__main__":
    key = jax.random.PRNGKey(0)
    x = jax.random.normal(key, (2, 3, 32, 32), jnp.float32)

    model = DeeplabV3EncoderPallas(in_dim=3, out_dim=256)
    out = model(x)
    out = jax.block_until_ready(out)

    assert out.shape == (2, 256, 32, 32), out.shape
    assert out.dtype == jnp.float32
    assert bool(jnp.all(jnp.isfinite(out)))
    print("KERNEL_OK")
</pallas_src>

<mosaic_0001>
module attributes {stable_mosaic.version = 11 : i64} {
  func.func @_gemm_bias_act_kernel(%arg0: i32, %arg1: i32, %arg2: i32, %arg3: memref<512x256xbf16, #tpu.memory_space<vmem>>, %arg4: memref<256x128xbf16, #tpu.memory_space<vmem>>, %arg5: memref<1x128xf32, #tpu.memory_space<vmem>>, %arg6: memref<512x128xbf16, #tpu.memory_space<vmem>>, %arg7: memref<512x128xf32, #tpu.memory_space<vmem>>) attributes {dimension_semantics = [#tpu.dimension_semantics<parallel>, #tpu.dimension_semantics<parallel>, #tpu.dimension_semantics<arbitrary>], iteration_bounds = array<i64: 1, 1, 1>, scalar_prefetch = 0 : i64, scratch_operands = 1 : i64, tpu.core_type = #tpu.core_type<tc>, window_params = [{transform_indices = @transform_0, window_bounds = array<i64: 512, 256>}, {transform_indices = @transform_1, window_bounds = array<i64: 256, 128>}, {transform_indices = @transform_2, window_bounds = array<i64: 1, 128>}, {transform_indices = @transform_3, window_bounds = array<i64: 512, 128>}]} {
    %c0_i32 = arith.constant 0 : i32
    %0 = arith.cmpi eq, %arg2, %c0_i32 : i32
    %1 = arith.extui %0 : i1 to i32
    %c0_i32_0 = arith.constant 0 : i32
    %2 = arith.cmpi ne, %1, %c0_i32_0 : i32
    scf.if %2 {
      %cst_10 = arith.constant 0.000000e+00 : f32
      %12 = vector.broadcast %cst_10 : f32 to vector<512x128xf32>
      %c0_11 = arith.constant 0 : index
      %c0_12 = arith.constant 0 : index
      %13 = vector.load %arg7[%c0_11, %c0_12] : memref<512x128xf32, #tpu.memory_space<vmem>>, vector<512x128xf32>
      tpu.vector_store %arg7[%c0_11, %c0_12], %12 {strides = array<i32>} : memref<512x128xf32, #tpu.memory_space<vmem>>, vector<512x128xf32>,
    } else {
    }
    %c0 = arith.constant 0 : index
    %c0_1 = arith.constant 0 : index
    %3 = vector.load %arg7[%c0, %c0_1] : memref<512x128xf32, #tpu.memory_space<vmem>>, vector<512x128xf32>
    %c0_2 = arith.constant 0 : index
    %c0_3 = arith.constant 0 : index
    %4 = vector.load %arg3[%c0_2, %c0_3] : memref<512x256xbf16, #tpu.memory_space<vmem>>, vector<512x256xbf16>
    %c0_4 = arith.constant 0 : index
    %c0_5 = arith.constant 0 : index
    %5 = vector.load %arg4[%c0_4, %c0_5] : memref<256x128xbf16, #tpu.memory_space<vmem>>, vector<256x128xbf16>
    %cst = arith.constant dense<0.000000e+00> : vector<512x128xf32>
    %6 = tpu.matmul %4, %5, %cst {dimension_numbers = #tpu.dot_dimension_numbers<[1], [0], [0], [1], [0, 0, 1, 1], [], []>} : vector<512x256xbf16>, vector<256x128xbf16>, vector<512x128xf32> -> vector<512x128xf32>
    %7 = arith.addf %3, %6 : vector<512x128xf32>
    %c0_6 = arith.constant 0 : index
    %c0_7 = arith.constant 0 : index
    %8 = vector.load %arg7[%c0_6, %c0_7] : memref<512x128xf32, #tpu.memory_space<vmem>>, vector<512x128xf32>
    tpu.vector_store %arg7[%c0_6, %c0_7], %7 {strides = array<i32>} : memref<512x128xf32, #tpu.memory_space<vmem>>, vector<512x128xf32>,
    %c0_i32_8 = arith.constant 0 : i32
    %9 = arith.cmpi eq, %arg2, %c0_i32_8 : i32
    %10 = arith.extui %9 : i1 to i32
    %c0_i32_9 = arith.constant 0 : i32
    %11 = arith.cmpi ne, %10, %c0_i32_9 : i32
    scf.if %11 {
      %c0_10 = arith.constant 0 : index
      %c0_11 = arith.constant 0 : index
      %12 = vector.load %arg7[%c0_10, %c0_11] : memref<512x128xf32, #tpu.memory_space<vmem>>, vector<512x128xf32>
      %c0_12 = arith.constant 0 : index
      %c0_13 = arith.constant 0 : index
      %13 = vector.load %arg5[%c0_12, %c0_13] : memref<1x128xf32, #tpu.memory_space<vmem>>, vector<1x128xf32>
      %14 = vector.broadcast %13 : vector<1x128xf32> to vector<512x128xf32>
      %15 = arith.addf %12, %14 : vector<512x128xf32>
      %cst_14 = arith.constant 0.000000e+00 : f32
      %16 = vector.broadcast %cst_14 : f32 to vector<512x128xf32>
      %17 = arith.maximumf %15, %16 : vector<512x128xf32>
      %18 = arith.truncf %17 : vector<512x128xf32> to vector<512x128xbf16>
      %c0_15 = arith.constant 0 : index
      %c0_16 = arith.constant 0 : index
      %19 = vector.load %arg6[%c0_15, %c0_16] : memref<512x128xbf16, #tpu.memory_space<vmem>>, vector<512x128xbf16>
      tpu.vector_store %arg6[%c0_15, %c0_16], %18 {strides = array<i32>} : memref<512x128xbf16, #tpu.memory_space<vmem>>, vector<512x128xbf16>,
    } else {
    }
    return
  }
  func.func @transform_0(%arg0: i32, %arg1: i32, %arg2: i32) -> (i32, i32) {
    %c0_i32 = arith.constant 0 : i32
    return %arg0, %arg2 : i32, i32
  }
  func.func @transform_1(%arg0: i32, %arg1: i32, %arg2: i32) -> (i32, i32) {
    %c0_i32 = arith.constant 0 : i32
    return %arg2, %arg1 : i32, i32
  }
  func.func @transform_2(%arg0: i32, %arg1: i32, %arg2: i32) -> (i32, i32) {
    %c0_i32 = arith.constant 0 : i32
    %c0_i32_0 = arith.constant 0 : i32
    return %c0_i32, %arg1 : i32, i32
  }
  func.func @transform_3(%arg0: i32, %arg1: i32, %arg2: i32) -> (i32, i32) {
    %c0_i32 = arith.constant 0 : i32
    return %arg0, %arg1 : i32, i32
  }
}

</mosaic_0001>

<bundles_post_ra>
// kernel: _conv_gemm_impl.1
= control target key start
LH: loop header
LB: loop body
LE: loop exit
PB: predicated region body
PF: predicated region fallthrough
CT: control target
= control target key end

     0   :  { %v2187_v1 = vmov 0   ;;  %s2564_s0 = inlined_call_operand.vmem [shape: bf16[512,256], index: 0, kind: input, shape index: {}]   ;;  %s2565_s1 = inlined_call_operand.vmem [shape: bf16[256,128], index: 1, kind: input, shape index: {}]   ;;  %s2566_s2 = inlined_call_operand.vmem [shape: f32[1,128], index: 2, kind: input, shape index: {}]   ;;  %s2567_s3 = inlined_call_operand.hbm [shape: bf16[512,128], index: 3, kind: output, shape index: {}]  }
   0x1   :  { %v2051_v0 = vld [vmem:[%s2565_s1] sm:$0xff]   ;;  %660 = vmatprep.subr.bf16.mxu0 %v2187_v1  ;;  %2015 = vmatprep.subr.bf16.mxu1 %v2187_v1  ;;  %v2052_v2 = vld [vmem:[%s2565_s1 + $0x8] sm:$0xff]   ;;  %v2053_v3 = vld [vmem:[%s2565_s1 + $0x10] sm:$0xff]  }
   0x2   :  { %661 = vmatpush1.bf16.msra.mxu0 %v2051_v0  ;;  %2031 = vmatpush1.bf16.msra.mxu1 %v2051_v0  ;;  %v2054_v4 = vld [vmem:[%s2565_s1 + $0x18] sm:$0xff]   ;;  %v2055_v5 = vld [vmem:[%s2565_s1 + $0x20] sm:$0xff]   ;;  %v2056_v7 = vld [vmem:[%s2565_s1 + $0x28] sm:$0xff]  }
   0x3   :  { %662 = vmatprep.subr.bf16.mxu0 %v2187_v1  ;;  %2016 = vmatprep.subr.bf16.mxu1 %v2187_v1  ;;  %v2069_v6 = vld [vmem:[%s2564_s0 + $0x4] ss:$8 sps:$4 sm:$0xff]   ;;  %v2057_v9 = vld [vmem:[%s2565_s1 + $0x30] sm:$0xff]   ;;  %v2058_v10 = vld [vmem:[%s2565_s1 + $0x38] sm:$0xff]  }
   0x4   :  { %v2072_v8 = vld [vmem:[%s2564_s0 + $0x104] ss:$8 sps:$4 sm:$0xff]   ;;  %692 = vmatprep.mubr.bf16.mxu0 %v2069_v6  ;;  %v2061_v13 = vld [vmem:[%s2565_s1 + $0x50] sm:$0xff]   ;;  %v2062_v14 = vld [vmem:[%s2565_s1 + $0x58] sm:$0xff]  }
   0x5   :  { %820 = vmatprep.mubr.bf16.mxu1 %v2072_v8  ;;  %v2059_v11 = vld [vmem:[%s2565_s1 + $0x40] sm:$0xff]   ;;  %v2060_v12 = vld [vmem:[%s2565_s1 + $0x48] sm:$0xff]   ;;  %v2065_v17 = vld [vmem:[%s2565_s1 + $0x70] sm:$0xff]  }
   0x6   :  { %663 = vmatpush1.bf16.msra.mxu0 %v2052_v2  ;;  %2032 = vmatpush1.bf16.msra.mxu1 %v2052_v2  ;;  %v2063_v15 = vld [vmem:[%s2565_s1 + $0x60] sm:$0xff]   ;;  %v2064_v16 = vld [vmem:[%s2565_s1 + $0x68] sm:$0xff]   ;;  %v2066_v18 = vld [vmem:[%s2565_s1 + $0x78] sm:$0xff]  }
   0x7   :  { %664 = vmatprep.subr.bf16.mxu0 %v2187_v1  ;;  %2017 = vmatprep.subr.bf16.mxu1 %v2187_v1 }
   0xa   :  { %665 = vmatpush1.bf16.msra.mxu0 %v2053_v3  ;;  %2033 = vmatpush1.bf16.msra.mxu1 %v2053_v3 }
   0xb   :  { %666 = vmatprep.subr.bf16.mxu0 %v2187_v1  ;;  %2018 = vmatprep.subr.bf16.mxu1 %v2187_v1 }
   0xe   :  { %667 = vmatpush1.bf16.msra.mxu0 %v2054_v4  ;;  %2034 = vmatpush1.bf16.msra.mxu1 %v2054_v4 }
   0xf   :  { %668 = vmatprep.subr.bf16.mxu0 %v2187_v1  ;;  %2019 = vmatprep.subr.bf16.mxu1 %v2187_v1 }
  0x12   :  { %669 = vmatpush1.bf16.msra.mxu0 %v2055_v5  ;;  %2035 = vmatpush1.bf16.msra.mxu1 %v2055_v5 }
  0x13   :  { %670 = vmatprep.subr.bf16.mxu0 %v2187_v1  ;;  %2020 = vmatprep.subr.bf16.mxu1 %v2187_v1 }
  0x16   :  { %671 = vmatpush1.bf16.msra.mxu0 %v2056_v7  ;;  %2036 = vmatpush1.bf16.msra.mxu1 %v2056_v7 }
  0x17   :  { %672 = vmatprep.subr.bf16.mxu0 %v2187_v1  ;;  %2021 = vmatprep.subr.bf16.mxu1 %v2187_v1 }
  0x1a   :  { %673 = vmatpush1.bf16.msra.mxu0 %v2057_v9  ;;  %2037 = vmatpush1.bf16.msra.mxu1 %v2057_v9 }
  0x1b   :  { %674 = vmatprep.subr.bf16.mxu0 %v2187_v1  ;;  %2022 = vmatprep.subr.bf16.mxu1 %v2187_v1 }
  0x1e   :  { %675 = vmatpush1.bf16.msra.mxu0 %v2058_v10  ;;  %2038 = vmatpush1.bf16.msra.mxu1 %v2058_v10 }
  0x1f   :  { %676 = vmatprep.subr.bf16.mxu0 %v2187_v1  ;;  %2023 = vmatprep.subr.bf16.mxu1 %v2187_v1 }
  0x22   :  { %677 = vmatpush1.bf16.msra.mxu0 %v2059_v11  ;;  %2039 = vmatpush1.bf16.msra.mxu1 %v2059_v11 }
  0x23   :  { %678 = vmatprep.subr.bf16.mxu0 %v2187_v1  ;;  %2024 = vmatprep.subr.bf16.mxu1 %v2187_v1 }
  0x26   :  { %679 = vmatpush1.bf16.msra.mxu0 %v2060_v12  ;;  %2040 = vmatpush1.bf16.msra.mxu1 %v2060_v12 }
  0x27   :  { %680 = vmatprep.subr.bf16.mxu0 %v2187_v1  ;;  %2025 = vmatprep.subr.bf16.mxu1 %v2187_v1 }
  0x2a   :  { %681 = vmatpush1.bf16.msra.mxu0 %v2061_v13  ;;  %2041 = vmatpush1.bf16.msra.mxu1 %v2061_v13 }
  0x2b   :  { %682 = vmatprep.subr.bf16.mxu0 %v2187_v1  ;;  %2026 = vmatprep.subr.bf16.mxu1 %v2187_v1 }
  0x2e   :  { %683 = vmatpush1.bf16.msra.mxu0 %v2062_v14  ;;  %2042 = vmatpush1.bf16.msra.mxu1 %v2062_v14 }
  0x2f   :  { %684 = vmatprep.subr.bf16.mxu0 %v2187_v1  ;;  %2027 = vmatprep.subr.bf16.mxu1 %v2187_v1 }
  0x32   :  { %685 = vmatpush1.bf16.msra.mxu0 %v2063_v15  ;;  %2043 = vmatpush1.bf16.msra.mxu1 %v2063_v15 }
  0x33   :  { %686 = vmatprep.subr.bf16.mxu0 %v2187_v1  ;;  %2028 = vmatprep.subr.bf16.mxu1 %v2187_v1 }
  0x36   :  { %687 = vmatpush1.bf16.msra.mxu0 %v2064_v16  ;;  %2044 = vmatpush1.bf16.msra.mxu1 %v2064_v16 }
  0x37   :  { %688 = vmatprep.subr.bf16.mxu0 %v2187_v1  ;;  %2029 = vmatprep.subr.bf16.mxu1 %v2187_v1 }
  0x3a   :  { %689 = vmatpush1.bf16.msra.mxu0 %v2065_v17  ;;  %2045 = vmatpush1.bf16.msra.mxu1 %v2065_v17 }
  0x3b   :  { %8 = vsyncpa [#allocation4], 0  ;;  %690 = vmatprep.subr.bf16.mxu0 %v2187_v1  ;;  %2030 = vmatprep.subr.bf16.mxu1 %v2187_v1  ;;  %v2067_v19 = vld [vmem:[%s2564_s0] ss:$8 sps:$4 sm:$0xff]   ;;  %v2073_v21 = vld [vmem:[%s2564_s0 + $0x14] ss:$8 sps:$4 sm:$0xff]  }
  0x3c   :  { %v2070_v20 = vld [vmem:[%s2564_s0 + $0x100] ss:$8 sps:$4 sm:$0xff]   ;;  %v2075_v22 = vld [vmem:[%s2564_s0 + $0x114] ss:$8 sps:$4 sm:$0xff]   ;;  %v2077_v23 = vld [vmem:[%s2564_s0 + $0x10] ss:$8 sps:$4 sm:$0xff]  }
  0x3d   :  { %v2078_v24 = vld [vmem:[%s2564_s0 + $0x110] ss:$8 sps:$4 sm:$0xff]   ;;  %v2079_v25 = vld [vmem:[%s2564_s0 + $0x24] ss:$8 sps:$4 sm:$0xff]   ;;  %v2083_v27 = vld [vmem:[%s2564_s0 + $0x20] ss:$8 sps:$4 sm:$0xff]  }
  0x3e   :  { %691 = vmatpush1.bf16.msra.mxu0 %v2066_v18  ;;  %2046 = vmatpush1.bf16.msra.mxu1 %v2066_v18  ;;  %v2081_v26 = vld [vmem:[%s2564_s0 + $0x124] ss:$8 sps:$4 sm:$0xff]   ;;  %v2084_v28 = vld [vmem:[%s2564_s0 + $0x120] ss:$8 sps:$4 sm:$0xff]   ;;  %v2085_v29 = vld [vmem:[%s2564_s0 + $0x34] ss:$8 sps:$4 sm:$0xff]  }
  0x3f   :  { %v2087_v30 = vld [vmem:[%s2564_s0 + $0x134] ss:$8 sps:$4 sm:$0xff]   ;;  %v2089_v31 = vld [vmem:[%s2564_s0 + $0x30] ss:$8 sps:$4 sm:$0xff]   ;;  %v2091_v33 = vld [vmem:[%s2564_s0 + $0x44] ss:$8 sps:$4 sm:$0xff]  }
  0x40   :  { %v2090_v32 = vld [vmem:[%s2564_s0 + $0x130] ss:$8 sps:$4 sm:$0xff]   ;;  %v2093_v34 = vld [vmem:[%s2564_s0 + $0x144] ss:$8 sps:$4 sm:$0xff]   ;;  %v2095_v35 = vld [vmem:[%s2564_s0 + $0x40] ss:$8 sps:$4 sm:$0xff]  }
  0x41   :  { %693 = vmatmul.mubr.bf16.vlgmr.msra.gmra.mrb[0].mxu0 %v2067_v19  ;;  %821 = vmatmul.mubr.bf16.vlgmr.msra.gmra.mrb[0].mxu1 %v2070_v20  ;;  %v2096_v36 = vld [vmem:[%s2564_s0 + $0x140] ss:$8 sps:$4 sm:$0xff]   ;;  %v2097_v37 = vld [vmem:[%s2564_s0 + $0x54] ss:$8 sps:$4 sm:$0xff]   ;;  %v2101_v39 = vld [vmem:[%s2564_s0 + $0x50] ss:$8 sps:$4 sm:$0xff]  }
  0x42   :  { %700 = vmatprep.mubr.bf16.mxu0 %v2073_v21  ;;  %828 = vmatprep.mubr.bf16.mxu1 %v2075_v22  ;;  %v2099_v38 = vld [vmem:[%s2564_s0 + $0x154] ss:$8 sps:$4 sm:$0xff]   ;;  %v2102_v40 = vld [vmem:[%s2564_s0 + $0x150] ss:$8 sps:$4 sm:$0xff]   ;;  %v2103_v41 = vld [vmem:[%s2564_s0 + $0x64] ss:$8 sps:$4 sm:$0xff]  }
  0x43   :  { %v2105_v42 = vld [vmem:[%s2564_s0 + $0x164] ss:$8 sps:$4 sm:$0xff]   ;;  %v2107_v43 = vld [vmem:[%s2564_s0 + $0x60] ss:$8 sps:$4 sm:$0xff]   ;;  %v2109_v45 = vld [vmem:[%s2564_s0 + $0x74] ss:$8 sps:$4 sm:$0xff]  }
  0x44   :  { %v2108_v44 = vld [vmem:[%s2564_s0 + $0x160] ss:$8 sps:$4 sm:$0xff]   ;;  %v2111_v46 = vld [vmem:[%s2564_s0 + $0x174] ss:$8 sps:$4 sm:$0xff]   ;;  %v2113_v47 = vld [vmem:[%s2564_s0 + $0x70] ss:$8 sps:$4 sm:$0xff]  }
  0x45   :  { %v2114_v48 = vld [vmem:[%s2564_s0 + $0x170] ss:$8 sps:$4 sm:$0xff]   ;;  %v2115_v49 = vld [vmem:[%s2564_s0 + $0x84] ss:$8 sps:$4 sm:$0xff]   ;;  %v2119_v51 = vld [vmem:[%s2564_s0 + $0x80] ss:$8 sps:$4 sm:$0xff]  }
  0x46   :  { %v2117_v50 = vld [vmem:[%s2564_s0 + $0x184] ss:$8 sps:$4 sm:$0xff]   ;;  %v2120_v52 = vld [vmem:[%s2564_s0 + $0x180] ss:$8 sps:$4 sm:$0xff]   ;;  %v2121_v53 = vld [vmem:[%s2564_s0 + $0x94] ss:$8 sps:$4 sm:$0xff]  }
  0x47   :  { %v2123_v54 = vld [vmem:[%s2564_s0 + $0x194] ss:$8 sps:$4 sm:$0xff]   ;;  %v2125_v55 = vld [vmem:[%s2564_s0 + $0x90] ss:$8 sps:$4 sm:$0xff]   ;;  %v2127_v57 = vld [vmem:[%s2564_s0 + $0xa4] ss:$8 sps:$4 sm:$0xff]  }
  0x48   :  { %v2126_v56 = vld [vmem:[%s2564_s0 + $0x190] ss:$8 sps:$4 sm:$0xff]   ;;  %v2129_v58 = vld [vmem:[%s2564_s0 + $0x1a4] ss:$8 sps:$4 sm:$0xff]   ;;  %v2131_v59 = vld [vmem:[%s2564_s0 + $0xa0] ss:$8 sps:$4 sm:$0xff]  }
  0x49   :  { %701 = vmatmul.mubr.bf16.gmra.mrb[4].mxu0 %v2077_v23  ;;  %829 = vmatmul.mubr.bf16.gmra.mrb[4].mxu1 %v2078_v24  ;;  %v2132_v60 = vld [vmem:[%s2564_s0 + $0x1a0] ss:$8 sps:$4 sm:$0xff]   ;;  %v2133_v61 = vld [vmem:[%s2564_s0 + $0xb4] ss:$8 sps:$4 sm:$0xff]   ;;  %v2137_v63 = vld [vmem:[%s2564_s0 + $0xb0] ss:$8 sps:$4 sm:$0xff]  }
  0x4a   :  { %708 = vmatprep.mubr.bf16.mxu0 %v2079_v25  ;;  %836 = vmatprep.mubr.bf16.mxu1 %v2081_v26  ;;  %v2135_v62 = vld [vmem:[%s2564_s0 + $0x1b4] ss:$8 sps:$4 sm:$0xff]   ;;  %v2138_v0 = vld [vmem:[%s2564_s0 + $0x1b0] ss:$8 sps:$4 sm:$0xff]   ;;  %v2139_v1 = vld [vmem:[%s2564_s0 + $0xc4] ss:$8 sps:$4 sm:$0xff]  }
  0x4b   :  { %v2141_v2 = vld [vmem:[%s2564_s0 + $0x1c4] ss:$8 sps:$4 sm:$0xff]   ;;  %v2143_v3 = vld [vmem:[%s2564_s0 + $0xc0] ss:$8 sps:$4 sm:$0xff]   ;;  %v2145_v5 = vld [vmem:[%s2564_s0 + $0xd4] ss:$8 sps:$4 sm:$0xff]  }
  0x4c   :  { %v2144_v4 = vld [vmem:[%s2564_s0 + $0x1c0] ss:$8 sps:$4 sm:$0xff]   ;;  %v2147_v6 = vld [vmem:[%s2564_s0 + $0x1d4] ss:$8 sps:$4 sm:$0xff]   ;;  %v2149_v7 = vld [vmem:[%s2564_s0 + $0xd0] ss:$8 sps:$4 sm:$0xff]  }
  0x4d   :  { %v2150_v8 = vld [vmem:[%s2564_s0 + $0x1d0] ss:$8 sps:$4 sm:$0xff]   ;;  %v2151_v9 = vld [vmem:[%s2564_s0 + $0xe4] ss:$8 sps:$4 sm:$0xff]   ;;  %v2155_v11 = vld [vmem:[%s2564_s0 + $0xe0] ss:$8 sps:$4 sm:$0xff]  }
  0x4e   :  { %v2153_v10 = vld [vmem:[%s2564_s0 + $0x1e4] ss:$8 sps:$4 sm:$0xff]   ;;  %v2156_v12 = vld [vmem:[%s2564_s0 + $0x1e0] ss:$8 sps:$4 sm:$0xff]   ;;  %v2157_v13 = vld [vmem:[%s2564_s0 + $0xf4] ss:$8 sps:$4 sm:$0xff]  }
  0x4f   :  { %v2159_v14 = vld [vmem:[%s2564_s0 + $0x1f4] ss:$8 sps:$4 sm:$0xff]   ;;  %v2161_v15 = vld [vmem:[%s2564_s0 + $0xf0] ss:$8 sps:$4 sm:$0xff]   ;;  %v2486_v17 = vld [vmem:[%s2566_s2] ss:$0 sm:$0xff] }
  0x50   :  { %v2162_v16 = vld [vmem:[%s2564_s0 + $0x1f0] ss:$8 sps:$4 sm:$0xff]   ;;  %s2188_s0 = smov [#allocation3]  }
  0x51   :  { %709 = vmatmul.mubr.bf16.gmra.mrb[8].mxu0 %v2083_v27  ;;  %837 = vmatmul.mubr.bf16.gmra.mrb[8].mxu1 %v2084_v28  ;;  %s1604_s2 = sshll.u32 %s2188_s0, 4  ;;  %s1605_s2 = int_to_ptr.vmem [resolvable:$true] %s1604_s2 }
  0x52   :  { %716 = vmatprep.mubr.bf16.mxu0 %v2085_v29  ;;  %844 = vmatprep.mubr.bf16.mxu1 %v2087_v30  ;;  %s2163_s7 = scalar_lea.vmem %s1605_s2, 4096  ;;  %p2168_p1 = scmp.lt.s32.totalorder %s1605_s2, %s1605_s2 }
  0x53   :  { %p2164_p0 = scmp.ne.s32.totalorder %s1605_s2, %s2163_s7  ;;  %p2169_p2 = scmp.lt.s32.totalorder %s2163_s7, %s2163_s7 }
  0x55   :  { %p2170_p3 = por %p2169_p2, %p2168_p1 }
  0x57   :  { %p2171_p4 = pnand %p2170_p3, %p2164_p0 }
  0x59   :  { %717 = vmatmul.mubr.bf16.gmra.mrb[12].mxu0 %v2089_v31  ;;  %845 = vmatmul.mubr.bf16.gmra.mrb[12].mxu1 %v2090_v32 }
  0x5a   :  { %724 = vmatprep.mubr.bf16.mxu0 %v2091_v33  ;;  %852 = vmatprep.mubr.bf16.mxu1 %v2093_v34 }
  0x61   :  { %725 = vmatmul.mubr.bf16.gmra.mrb[16].mxu0 %v2095_v35  ;;  %853 = vmatmul.mubr.bf16.gmra.mrb[16].mxu1 %v2096_v36 }
  0x62   :  { %732 = vmatprep.mubr.bf16.mxu0 %v2097_v37  ;;  %860 = vmatprep.mubr.bf16.mxu1 %v2099_v38 }
  0x69   :  { %733 = vmatmul.mubr.bf16.gmra.mrb[20].mxu0 %v2101_v39  ;;  %861 = vmatmul.mubr.bf16.gmra.mrb[20].mxu1 %v2102_v40 }
  0x6a   :  { %740 = vmatprep.mubr.bf16.mxu0 %v2103_v41  ;;  %868 = vmatprep.mubr.bf16.mxu1 %v2105_v42 }
  0x71   :  { %741 = vmatmul.mubr.bf16.gmra.mrb[24].mxu0 %v2107_v43  ;;  %869 = vmatmul.mubr.bf16.gmra.mrb[24].mxu1 %v2108_v44 }
  0x72   :  { %748 = vmatprep.mubr.bf16.mxu0 %v2109_v45  ;;  %876 = vmatprep.mubr.bf16.mxu1 %v2111_v46 }
  0x79   :  { %749 = vmatmul.mubr.bf16.gmra.mrb[28].mxu0 %v2113_v47  ;;  %877 = vmatmul.mubr.bf16.gmra.mrb[28].mxu1 %v2114_v48 }
  0x7a   :  { %756 = vmatprep.mubr.bf16.mxu0 %v2115_v49  ;;  %884 = vmatprep.mubr.bf16.mxu1 %v2117_v50 }
  0x81   :  { %757 = vmatmul.mubr.bf16.gmra.mrb[32].mxu0 %v2119_v51  ;;  %885 = vmatmul.mubr.bf16.gmra.mrb[32].mxu1 %v2120_v52 }
  0x82   :  { %764 = vmatprep.mubr.bf16.mxu0 %v2121_v53  ;;  %892 = vmatprep.mubr.bf16.mxu1 %v2123_v54 }
  0x89   :  { %765 = vmatmul.mubr.bf16.gmra.mrb[36].mxu0 %v2125_v55  ;;  %893 = vmatmul.mubr.bf16.gmra.mrb[36].mxu1 %v2126_v56 }
  0x8a   :  { %772 = vmatprep.mubr.bf16.mxu0 %v2127_v57  ;;  %900 = vmatprep.mubr.bf16.mxu1 %v2129_v58 }
  0x91   :  { %773 = vmatmul.mubr.bf16.gmra.mrb[40].mxu0 %v2131_v59  ;;  %901 = vmatmul.mubr.bf16.gmra.mrb[40].mxu1 %v2132_v60 }
  0x92   :  { %780 = vmatprep.mubr.bf16.mxu0 %v2133_v61  ;;  %908 = vmatprep.mubr.bf16.mxu1 %v2135_v62 }
  0x99   :  { %781 = vmatmul.mubr.bf16.gmra.mrb[44].mxu0 %v2137_v63  ;;  %909 = vmatmul.mubr.bf16.gmra.mrb[44].mxu1 %v2138_v0 }
  0x9a   :  { %788 = vmatprep.mubr.bf16.mxu0 %v2139_v1  ;;  %916 = vmatprep.mubr.bf16.mxu1 %v2141_v2 }
  0xa1   :  { %789 = vmatmul.mubr.bf16.gmra.mrb[48].mxu0 %v2143_v3  ;;  %917 = vmatmul.mubr.bf16.gmra.mrb[48].mxu1 %v2144_v4 }
  0xa2   :  { %796 = vmatprep.mubr.bf16.mxu0 %v2145_v5  ;;  %924 = vmatprep.mubr.bf16.mxu1 %v2147_v6 }
  0xa9   :  { %797 = vmatmul.mubr.bf16.gmra.mrb[52].mxu0 %v2149_v7  ;;  %925 = vmatmul.mubr.bf16.gmra.mrb[52].mxu1 %v2150_v8 }
  0xaa   :  { %804 = vmatprep.mubr.bf16.mxu0 %v2151_v9  ;;  %932 = vmatprep.mubr.bf16.mxu1 %v2153_v10 }
  0xb1   :  { %805 = vmatmul.mubr.bf16.gmra.mrb[56].mxu0 %v2155_v11  ;;  %933 = vmatmul.mubr.bf16.gmra.mrb[56].mxu1 %v2156_v12 }
  0xb2   :  { %812 = vmatprep.mubr.bf16.mxu0 %v2157_v13  ;;  %940 = vmatprep.mubr.bf16.mxu1 %v2159_v14 }
  0xb9   :  { %813 = vmatmul.mubr.bf16.gmra.mrb[60].mxu0 %v2161_v15  ;;  %941 = vmatmul.mubr.bf16.gmra.mrb[60].mxu1 %v2162_v16 }
 0x114   :  { %v694_v18 = vpop.f32.mrb[0].mxu0  ;;  %v822_v19 = vpop.f32.mrb[0].mxu1 }
 0x115   :  { %v1151_v20 = vadd.f32 %v2486_v17, %v694_v18  ;;  %v1183_v21 = vadd.f32 %v2486_v17, %v822_v19  ;;  %v696_v22 = vpop.f32.mrb[1].mxu0  ;;  %v824_v23 = vpop.f32.mrb[1].mxu1 }
 0x116   :  { %v697_v24 = vpop.f32.mrb[2].mxu0  ;;  %v825_v25 = vpop.f32.mrb[2].mxu1 }
 0x117   :  { %v1152_v26 = vadd.f32 %v2486_v17, %v697_v24  ;;  %v1184_v27 = vadd.f32 %v2486_v17, %v825_v25  ;;  %v699_v28 = vpop.f32.mrb[3].mxu0  ;;  %v827_v29 = vpop.f32.mrb[3].mxu1  ;;  %v1215_v30 = vmax.f32 %v1151_v20, 0.0  ;;  %v1247_v31 = vmax.f32 %v1183_v21, 0.0 }
 0x119   :  { %v1216_v32 = vmax.f32 %v1152_v26, 0.0  ;;  %v1248_v33 = vmax.f32 %v1184_v27, 0.0 }
 0x11b   :  { %v1827_v34 = vpack.c.bf16 %v1216_v32, %v1215_v30  ;;  %v1907_v35 = vpack.c.bf16 %v1248_v33, %v1247_v31 }
 0x11c   :  { %v702_v36 = vpop.f32.mrb[4].mxu0  ;;  %v830_v37 = vpop.f32.mrb[4].mxu1 }
 0x11d   :  { %1828 = vst [vmem:[#allocation3] sm:$0xff] %v1827_v34   ;;  %1999 = vst [vmem:[#allocation3 + $0x80] sm:$0xff] %v1907_v35   ;;  %v1153_v38 = vadd.f32 %v2486_v17, %v702_v36  ;;  %v1185_v39 = vadd.f32 %v2486_v17, %v830_v37  ;;  %v704_v40 = vpop.f32.mrb[5].mxu0  ;;  %v832_v41 = vpop.f32.mrb[5].mxu1 }
 0x11e   :  { %v705_v42 = vpop.f32.mrb[6].mxu0  ;;  %v833_v43 = vpop.f32.mrb[6].mxu1 }
 0x11f   :  { %v1154_v44 = vadd.f32 %v2486_v17, %v705_v42  ;;  %v1186_v45 = vadd.f32 %v2486_v17, %v833_v43  ;;  %v707_v46 = vpop.f32.mrb[7].mxu0  ;;  %v835_v47 = vpop.f32.mrb[7].mxu1  ;;  %v1217_v48 = vmax.f32 %v1153_v38, 0.0  ;;  %v1249_v49 = vmax.f32 %v1185_v39, 0.0 }
 0x121   :  { %v1218_v50 = vmax.f32 %v1154_v44, 0.0  ;;  %v1250_v51 = vmax.f32 %v1186_v45, 0.0 }
 0x123   :  { %v1832_v52 = vpack.c.bf16 %v1218_v50, %v1217_v48  ;;  %v1912_v53 = vpack.c.bf16 %v1250_v51, %v1249_v49 }
 0x124   :  { %v710_v54 = vpop.f32.mrb[8].mxu0  ;;  %v838_v55 = vpop.f32.mrb[8].mxu1 }
 0x125   :  { %1984 = vst [vmem:[#allocation3 + $0x8] sm:$0xff] %v1832_v52   ;;  %2000 = vst [vmem:[#allocation3 + $0x88] sm:$0xff] %v1912_v53   ;;  %v1155_v56 = vadd.f32 %v2486_v17, %v710_v54  ;;  %v1187_v57 = vadd.f32 %v2486_v17, %v838_v55  ;;  %v712_v58 = vpop.f32.mrb[9].mxu0  ;;  %v840_v59 = vpop.f32.mrb[9].mxu1 }
 0x126   :  { %v713_v60 = vpop.f32.mrb[10].mxu0  ;;  %v841_v61 = vpop.f32.mrb[10].mxu1 }
 0x127   :  { %v1156_v62 = vadd.f32 %v2486_v17, %v713_v60  ;;  %v1188_v63 = vadd.f32 %v2486_v17, %v841_v61  ;;  %v715_v0 = vpop.f32.mrb[11].mxu0  ;;  %v843_v1 = vpop.f32.mrb[11].mxu1  ;;  %v1219_v2 = vmax.f32 %v1155_v56, 0.0  ;;  %v1251_v3 = vmax.f32 %v1187_v57, 0.0 }
 0x129   :  { %v1220_v4 = vmax.f32 %v1156_v62, 0.0  ;;  %v1252_v5 = vmax.f32 %v1188_v63, 0.0 }
 0x12b   :  { %v1837_v6 = vpack.c.bf16 %v1220_v4, %v1219_v2  ;;  %v1917_v7 = vpack.c.bf16 %v1252_v5, %v1251_v3 }
 0x12c   :  { %v718_v8 = vpop.f32.mrb[12].mxu0  ;;  %v846_v9 = vpop.f32.mrb[12].mxu1 }
 0x12d   :  { %1985 = vst [vmem:[#allocation3 + $0x10] sm:$0xff] %v1837_v6   ;;  %2001 = vst [vmem:[#allocation3 + $0x90] sm:$0xff] %v1917_v7   ;;  %v1157_v10 = vadd.f32 %v2486_v17, %v718_v8  ;;  %v1189_v11 = vadd.f32 %v2486_v17, %v846_v9  ;;  %v720_v12 = vpop.f32.mrb[13].mxu0  ;;  %v848_v13 = vpop.f32.mrb[13].mxu1 }
 0x12e   :  { %v721_v14 = vpop.f32.mrb[14].mxu0  ;;  %v849_v15 = vpop.f32.mrb[14].mxu1 }
 0x12f   :  { %v1158_v16 = vadd.f32 %v2486_v17, %v721_v14  ;;  %v1190_v18 = vadd.f32 %v2486_v17, %v849_v15  ;;  %v723_v19 = vpop.f32.mrb[15].mxu0  ;;  %v851_v20 = vpop.f32.mrb[15].mxu1  ;;  %v1221_v21 = vmax.f32 %v1157_v10, 0.0  ;;  %v1253_v22 = vmax.f32 %v1189_v11, 0.0 }
 0x131   :  { %v1222_v23 = vmax.f32 %v1158_v16, 0.0  ;;  %v1254_v24 = vmax.f32 %v1190_v18, 0.0 }
 0x133   :  { %v1842_v25 = vpack.c.bf16 %v1222_v23, %v1221_v21  ;;  %v1922_v26 = vpack.c.bf16 %v1254_v24, %v1253_v22 }
 0x134   :  { %v726_v27 = vpop.f32.mrb[16].mxu0  ;;  %v854_v28 = vpop.f32.mrb[16].mxu1 }
 0x135   :  { %1986 = vst [vmem:[#allocation3 + $0x18] sm:$0xff] %v1842_v25   ;;  %2002 = vst [vmem:[#allocation3 + $0x98] sm:$0xff] %v1922_v26   ;;  %v1159_v29 = vadd.f32 %v2486_v17, %v726_v27  ;;  %v1191_v30 = vadd.f32 %v2486_v17, %v854_v28  ;;  %v728_v31 = vpop.f32.mrb[17].mxu0  ;;  %v856_v32 = vpop.f32.mrb[17].mxu1 }
 0x136   :  { %v729_v33 = vpop.f32.mrb[18].mxu0  ;;  %v857_v34 = vpop.f32.mrb[18].mxu1 }
 0x137   :  { %v1160_v35 = vadd.f32 %v2486_v17, %v729_v33  ;;  %v1192_v36 = vadd.f32 %v2486_v17, %v857_v34  ;;  %v731_v37 = vpop.f32.mrb[19].mxu0  ;;  %v859_v38 = vpop.f32.mrb[19].mxu1  ;;  %v1223_v39 = vmax.f32 %v1159_v29, 0.0  ;;  %v1255_v40 = vmax.f32 %v1191_v30, 0.0 }
 0x139   :  { %v1224_v41 = vmax.f32 %v1160_v35, 0.0  ;;  %v1256_v42 = vmax.f32 %v1192_v36, 0.0 }
 0x13b   :  { %v1847_v43 = vpack.c.bf16 %v1224_v41, %v1223_v39  ;;  %v1927_v44 = vpack.c.bf16 %v1256_v42, %v1255_v40 }
 0x13c   :  { %v734_v45 = vpop.f32.mrb[20].mxu0  ;;  %v862_v46 = vpop.f32.mrb[20].mxu1 }
 0x13d   :  { %1987 = vst [vmem:[#allocation3 + $0x20] sm:$0xff] %v1847_v43   ;;  %2003 = vst [vmem:[#allocation3 + $0xa0] sm:$0xff] %v1927_v44   ;;  %v1161_v47 = vadd.f32 %v2486_v17, %v734_v45  ;;  %v1193_v48 = vadd.f32 %v2486_v17, %v862_v46  ;;  %v736_v49 = vpop.f32.mrb[21].mxu0  ;;  %v864_v50 = vpop.f32.mrb[21].mxu1 }
 0x13e   :  { %v737_v51 = vpop.f32.mrb[22].mxu0  ;;  %v865_v52 = vpop.f32.mrb[22].mxu1 }
 0x13f   :  { %v1162_v53 = vadd.f32 %v2486_v17, %v737_v51  ;;  %v1194_v54 = vadd.f32 %v2486_v17, %v865_v52  ;;  %v739_v55 = vpop.f32.mrb[23].mxu0  ;;  %v867_v56 = vpop.f32.mrb[23].mxu1  ;;  %v1225_v57 = vmax.f32 %v1161_v47, 0.0  ;;  %v1257_v58 = vmax.f32 %v1193_v48, 0.0 }
 0x141   :  { %v1226_v59 = vmax.f32 %v1162_v53, 0.0  ;;  %v1258_v60 = vmax.f32 %v1194_v54, 0.0 }
 0x143   :  { %v1852_v61 = vpack.c.bf16 %v1226_v59, %v1225_v57  ;;  %v1932_v62 = vpack.c.bf16 %v1258_v60, %v1257_v58 }
 0x144   :  { %v742_v63 = vpop.f32.mrb[24].mxu0  ;;  %v870_v0 = vpop.f32.mrb[24].mxu1 }
 0x145   :  { %1988 = vst [vmem:[#allocation3 + $0x28] sm:$0xff] %v1852_v61   ;;  %2004 = vst [vmem:[#allocation3 + $0xa8] sm:$0xff] %v1932_v62   ;;  %v1163_v1 = vadd.f32 %v2486_v17, %v742_v63  ;;  %v1195_v2 = vadd.f32 %v2486_v17, %v870_v0  ;;  %v744_v3 = vpop.f32.mrb[25].mxu0  ;;  %v872_v4 = vpop.f32.mrb[25].mxu1 }
 0x146   :  { %v745_v5 = vpop.f32.mrb[26].mxu0  ;;  %v873_v6 = vpop.f32.mrb[26].mxu1 }
 0x147   :  { %v1164_v7 = vadd.f32 %v2486_v17, %v745_v5  ;;  %v1196_v8 = vadd.f32 %v2486_v17, %v873_v6  ;;  %v747_v9 = vpop.f32.mrb[27].mxu0  ;;  %v875_v10 = vpop.f32.mrb[27].mxu1  ;;  %v1227_v11 = vmax.f32 %v1163_v1, 0.0  ;;  %v1259_v12 = vmax.f32 %v1195_v2, 0.0 }
 0x149   :  { %v1228_v13 = vmax.f32 %v1164_v7, 0.0  ;;  %v1260_v14 = vmax.f32 %v1196_v8, 0.0 }
 0x14b   :  { %v1857_v15 = vpack.c.bf16 %v1228_v13, %v1227_v11  ;;  %v1937_v16 = vpack.c.bf16 %v1260_v14, %v1259_v12 }
 0x14c   :  { %v750_v18 = vpop.f32.mrb[28].mxu0  ;;  %v878_v19 = vpop.f32.mrb[28].mxu1 }
 0x14d   :  { %1989 = vst [vmem:[#allocation3 + $0x30] sm:$0xff] %v1857_v15   ;;  %2005 = vst [vmem:[#allocation3 + $0xb0] sm:$0xff] %v1937_v16   ;;  %v1165_v20 = vadd.f32 %v2486_v17, %v750_v18  ;;  %v1197_v21 = vadd.f32 %v2486_v17, %v878_v19  ;;  %v752_v22 = vpop.f32.mrb[29].mxu0  ;;  %v880_v23 = vpop.f32.mrb[29].mxu1 }
 0x14e   :  { %v753_v24 = vpop.f32.mrb[30].mxu0  ;;  %v881_v25 = vpop.f32.mrb[30].mxu1 }
 0x14f   :  { %v1166_v26 = vadd.f32 %v2486_v17, %v753_v24  ;;  %v1198_v27 = vadd.f32 %v2486_v17, %v881_v25  ;;  %v755_v28 = vpop.f32.mrb[31].mxu0  ;;  %v883_v29 = vpop.f32.mrb[31].mxu1  ;;  %v1229_v30 = vmax.f32 %v1165_v20, 0.0  ;;  %v1261_v31 = vmax.f32 %v1197_v21, 0.0 }
 0x151   :  { %v1230_v32 = vmax.f32 %v1166_v26, 0.0  ;;  %v1262_v33 = vmax.f32 %v1198_v27, 0.0 }
 0x153   :  { %v1862_v34 = vpack.c.bf16 %v1230_v32, %v1229_v30  ;;  %v1942_v35 = vpack.c.bf16 %v1262_v33, %v1261_v31 }
 0x154   :  { %v758_v36 = vpop.f32.mrb[32].mxu0  ;;  %v886_v37 = vpop.f32.mrb[32].mxu1 }
 0x155   :  { %1990 = vst [vmem:[#allocation3 + $0x38] sm:$0xff] %v1862_v34   ;;  %2006 = vst [vmem:[#allocation3 + $0xb8] sm:$0xff] %v1942_v35   ;;  %v1167_v38 = vadd.f32 %v2486_v17, %v758_v36  ;;  %v1199_v39 = vadd.f32 %v2486_v17, %v886_v37  ;;  %v760_v40 = vpop.f32.mrb[33].mxu0  ;;  %v888_v41 = vpop.f32.mrb[33].mxu1 }
 0x156   :  { %v761_v42 = vpop.f32.mrb[34].mxu0  ;;  %v889_v43 = vpop.f32.mrb[34].mxu1 }
 0x157   :  { %v1168_v44 = vadd.f32 %v2486_v17, %v761_v42  ;;  %v1200_v45 = vadd.f32 %v2486_v17, %v889_v43  ;;  %v763_v46 = vpop.f32.mrb[35].mxu0  ;;  %v891_v47 = vpop.f32.mrb[35].mxu1  ;;  %v1231_v48 = vmax.f32 %v1167_v38, 0.0  ;;  %v1263_v49 = vmax.f32 %v1199_v39, 0.0 }
 0x159   :  { %v1232_v50 = vmax.f32 %v1168_v44, 0.0  ;;  %v1264_v51 = vmax.f32 %v1200_v45, 0.0 }
 0x15b   :  { %v1867_v52 = vpack.c.bf16 %v1232_v50, %v1231_v48  ;;  %v1947_v53 = vpack.c.bf16 %v1264_v51, %v1263_v49 }
 0x15c   :  { %v766_v54 = vpop.f32.mrb[36].mxu0  ;;  %v894_v55 = vpop.f32.mrb[36].mxu1 }
 0x15d   :  { %1991 = vst [vmem:[#allocation3 + $0x40] sm:$0xff] %v1867_v52   ;;  %2007 = vst [vmem:[#allocation3 + $0xc0] sm:$0xff] %v1947_v53   ;;  %v1169_v56 = vadd.f32 %v2486_v17, %v766_v54  ;;  %v1201_v57 = vadd.f32 %v2486_v17, %v894_v55  ;;  %v768_v58 = vpop.f32.mrb[37].mxu0  ;;  %v896_v59 = vpop.f32.mrb[37].mxu1 }
 0x15e   :  { %v769_v60 = vpop.f32.mrb[38].mxu0  ;;  %v897_v61 = vpop.f32.mrb[38].mxu1 }
 0x15f   :  { %v1170_v62 = vadd.f32 %v2486_v17, %v769_v60  ;;  %v1202_v63 = vadd.f32 %v2486_v17, %v897_v61  ;;  %v771_v0 = vpop.f32.mrb[39].mxu0  ;;  %v899_v1 = vpop.f32.mrb[39].mxu1  ;;  %v1233_v2 = vmax.f32 %v1169_v56, 0.0  ;;  %v1265_v3 = vmax.f32 %v1201_v57, 0.0 }
 0x161   :  { %v1234_v4 = vmax.f32 %v1170_v62, 0.0  ;;  %v1266_v5 = vmax.f32 %v1202_v63, 0.0 }
 0x163   :  { %v1872_v6 = vpack.c.bf16 %v1234_v4, %v1233_v2  ;;  %v1952_v7 = vpack.c.bf16 %v1266_v5, %v1265_v3 }
 0x164   :  { %v774_v8 = vpop.f32.mrb[40].mxu0  ;;  %v902_v9 = vpop.f32.mrb[40].mxu1 }
 0x165   :  { %1992 = vst [vmem:[#allocation3 + $0x48] sm:$0xff] %v1872_v6   ;;  %2008 = vst [vmem:[#allocation3 + $0xc8] sm:$0xff] %v1952_v7   ;;  %v1171_v10 = vadd.f32 %v2486_v17, %v774_v8  ;;  %v1203_v11 = vadd.f32 %v2486_v17, %v902_v9  ;;  %v776_v12 = vpop.f32.mrb[41].mxu0  ;;  %v904_v13 = vpop.f32.mrb[41].mxu1 }
 0x166   :  { %v777_v14 = vpop.f32.mrb[42].mxu0  ;;  %v905_v15 = vpop.f32.mrb[42].mxu1 }
 0x167   :  { %v1172_v16 = vadd.f32 %v2486_v17, %v777_v14  ;;  %v1204_v18 = vadd.f32 %v2486_v17, %v905_v15  ;;  %v779_v19 = vpop.f32.mrb[43].mxu0  ;;  %v907_v20 = vpop.f32.mrb[43].mxu1  ;;  %v1235_v21 = vmax.f32 %v1171_v10, 0.0  ;;  %v1267_v22 = vmax.f32 %v1203_v11, 0.0 }
 0x169   :  { %v1236_v23 = vmax.f32 %v1172_v16, 0.0  ;;  %v1268_v24 = vmax.f32 %v1204_v18, 0.0 }
 0x16b   :  { %v1877_v25 = vpack.c.bf16 %v1236_v23, %v1235_v21  ;;  %v1957_v26 = vpack.c.bf16 %v1268_v24, %v1267_v22 }
 0x16c   :  { %v782_v27 = vpop.f32.mrb[44].mxu0  ;;  %v910_v28 = vpop.f32.mrb[44].mxu1 }
 0x16d   :  { %1993 = vst [vmem:[#allocation3 + $0x50] sm:$0xff] %v1877_v25   ;;  %2009 = vst [vmem:[#allocation3 + $0xd0] sm:$0xff] %v1957_v26   ;;  %v1173_v29 = vadd.f32 %v2486_v17, %v782_v27  ;;  %v1205_v30 = vadd.f32 %v2486_v17, %v910_v28  ;;  %v784_v31 = vpop.f32.mrb[45].mxu0  ;;  %v912_v32 = vpop.f32.mrb[45].mxu1 }
 0x16e   :  { %v785_v33 = vpop.f32.mrb[46].mxu0  ;;  %v913_v34 = vpop.f32.mrb[46].mxu1 }
 0x16f   :  { %v1174_v35 = vadd.f32 %v2486_v17, %v785_v33  ;;  %v1206_v36 = vadd.f32 %v2486_v17, %v913_v34  ;;  %v787_v37 = vpop.f32.mrb[47].mxu0  ;;  %v915_v38 = vpop.f32.mrb[47].mxu1  ;;  %v1237_v39 = vmax.f32 %v1173_v29, 0.0  ;;  %v1269_v40 = vmax.f32 %v1205_v30, 0.0 }
 0x171   :  { %v1238_v41 = vmax.f32 %v1174_v35, 0.0  ;;  %v1270_v42 = vmax.f32 %v1206_v36, 0.0 }
 0x173   :  { %v1882_v43 = vpack.c.bf16 %v1238_v41, %v1237_v39  ;;  %v1962_v44 = vpack.c.bf16 %v1270_v42, %v1269_v40 }
 0x174   :  { %v790_v45 = vpop.f32.mrb[48].mxu0  ;;  %v918_v46 = vpop.f32.mrb[48].mxu1 }
 0x175   :  { %1994 = vst [vmem:[#allocation3 + $0x58] sm:$0xff] %v1882_v43   ;;  %2010 = vst [vmem:[#allocation3 + $0xd8] sm:$0xff] %v1962_v44   ;;  %v1175_v47 = vadd.f32 %v2486_v17, %v790_v45  ;;  %v1207_v48 = vadd.f32 %v2486_v17, %v918_v46  ;;  %v792_v49 = vpop.f32.mrb[49].mxu0  ;;  %v920_v50 = vpop.f32.mrb[49].mxu1 }
 0x176   :  { %v793_v51 = vpop.f32.mrb[50].mxu0  ;;  %v921_v52 = vpop.f32.mrb[50].mxu1 }
 0x177   :  { %v1176_v53 = vadd.f32 %v2486_v17, %v793_v51  ;;  %v1208_v54 = vadd.f32 %v2486_v17, %v921_v52  ;;  %v795_v55 = vpop.f32.mrb[51].mxu0  ;;  %v923_v56 = vpop.f32.mrb[51].mxu1  ;;  %v1239_v57 = vmax.f32 %v1175_v47, 0.0  ;;  %v1271_v58 = vmax.f32 %v1207_v48, 0.0 }
 0x179   :  { %v1240_v59 = vmax.f32 %v1176_v53, 0.0  ;;  %v1272_v60 = vmax.f32 %v1208_v54, 0.0 }
 0x17b   :  { %v1887_v61 = vpack.c.bf16 %v1240_v59, %v1239_v57  ;;  %v1967_v62 = vpack.c.bf16 %v1272_v60, %v1271_v58 }
 0x17c   :  { %v798_v63 = vpop.f32.mrb[52].mxu0  ;;  %v926_v0 = vpop.f32.mrb[52].mxu1 }
 0x17d   :  { %1995 = vst [vmem:[#allocation3 + $0x60] sm:$0xff] %v1887_v61   ;;  %2011 = vst [vmem:[#allocation3 + $0xe0] sm:$0xff] %v1967_v62   ;;  %v1177_v1 = vadd.f32 %v2486_v17, %v798_v63  ;;  %v1209_v2 = vadd.f32 %v2486_v17, %v926_v0  ;;  %v800_v3 = vpop.f32.mrb[53].mxu0  ;;  %v928_v4 = vpop.f32.mrb[53].mxu1 }
 0x17e   :  { %v801_v5 = vpop.f32.mrb[54].mxu0  ;;  %v929_v6 = vpop.f32.mrb[54].mxu1 }
 0x17f   :  { %v1178_v7 = vadd.f32 %v2486_v17, %v801_v5  ;;  %v1210_v8 = vadd.f32 %v2486_v17, %v929_v6  ;;  %v803_v9 = vpop.f32.mrb[55].mxu0  ;;  %v931_v10 = vpop.f32.mrb[55].mxu1  ;;  %v1241_v11 = vmax.f32 %v1177_v1, 0.0  ;;  %v1273_v12 = vmax.f32 %v1209_v2, 0.0 }
 0x181   :  { %v1242_v13 = vmax.f32 %v1178_v7, 0.0  ;;  %v1274_v14 = vmax.f32 %v1210_v8, 0.0 }
 0x183   :  { %v1892_v15 = vpack.c.bf16 %v1242_v13, %v1241_v11  ;;  %v1972_v16 = vpack.c.bf16 %v1274_v14, %v1273_v12 }
 0x184   :  { %v806_v18 = vpop.f32.mrb[56].mxu0  ;;  %v934_v19 = vpop.f32.mrb[56].mxu1 }
 0x185   :  { %1996 = vst [vmem:[#allocation3 + $0x68] sm:$0xff] %v1892_v15   ;;  %2012 = vst [vmem:[#allocation3 + $0xe8] sm:$0xff] %v1972_v16   ;;  %v1179_v20 = vadd.f32 %v2486_v17, %v806_v18  ;;  %v1211_v21 = vadd.f32 %v2486_v17, %v934_v19  ;;  %v808_v22 = vpop.f32.mrb[57].mxu0  ;;  %v936_v23 = vpop.f32.mrb[57].mxu1 }
 0x186   :  { %v809_v24 = vpop.f32.mrb[58].mxu0  ;;  %v937_v25 = vpop.f32.mrb[58].mxu1 }
 0x187   :  { %v1180_v26 = vadd.f32 %v2486_v17, %v809_v24  ;;  %v1212_v27 = vadd.f32 %v2486_v17, %v937_v25  ;;  %v811_v28 = vpop.f32.mrb[59].mxu0  ;;  %v939_v29 = vpop.f32.mrb[59].mxu1  ;;  %v1243_v30 = vmax.f32 %v1179_v20, 0.0  ;;  %v1275_v31 = vmax.f32 %v1211_v21, 0.0 }
 0x189   :  { %v1244_v32 = vmax.f32 %v1180_v26, 0.0  ;;  %v1276_v33 = vmax.f32 %v1212_v27, 0.0 }
 0x18b   :  { %v1897_v34 = vpack.c.bf16 %v1244_v32, %v1243_v30  ;;  %v1977_v35 = vpack.c.bf16 %v1276_v33, %v1275_v31 }
 0x18c   :  { %v814_v36 = vpop.f32.mrb[60].mxu0  ;;  %v942_v37 = vpop.f32.mrb[60].mxu1 }
 0x18d   :  { %1997 = vst [vmem:[#allocation3 + $0x70] sm:$0xff] %v1897_v34   ;;  %2013 = vst [vmem:[#allocation3 + $0xf0] sm:$0xff] %v1977_v35   ;;  %v1181_v38 = vadd.f32 %v2486_v17, %v814_v36  ;;  %v1213_v39 = vadd.f32 %v2486_v17, %v942_v37  ;;  %v816_v40 = vpop.f32.mrb[61].mxu0  ;;  %v944_v41 = vpop.f32.mrb[61].mxu1 }
 0x18e   :  { %v817_v42 = vpop.f32.mrb[62].mxu0  ;;  %v945_v43 = vpop.f32.mrb[62].mxu1 }
 0x18f   :  { %v1182_v44 = vadd.f32 %v2486_v17, %v817_v42  ;;  %v1214_v45 = vadd.f32 %v2486_v17, %v945_v43  ;;  %v819_v46 = vpop.f32.mrb[63].mxu0  ;;  %v947_v47 = vpop.f32.mrb[63].mxu1  ;;  %v1245_v48 = vmax.f32 %v1181_v38, 0.0  ;;  %v1277_v49 = vmax.f32 %v1213_v39, 0.0 }
 0x191   :  { %v1246_v50 = vmax.f32 %v1182_v44, 0.0  ;;  %v1278_v51 = vmax.f32 %v1214_v45, 0.0 }
 0x193   :  { %v1902_v52 = vpack.c.bf16 %v1246_v50, %v1245_v48  ;;  %v1982_v53 = vpack.c.bf16 %v1278_v51, %v1277_v49 }
 0x195   :  { %1998 = vst [vmem:[#allocation3 + $0x78] sm:$0xff] %v1902_v52   ;;  %2014 = vst [vmem:[#allocation3 + $0xf8] sm:$0xff] %v1982_v53  }
 0x196   :  { %2174 = shalt.err (!%p2171_p4)
}
 0x197   :  { %s2175_s10 = scalar_lea.hbm %s2567_s3, 4096 }
 0x198   :  { %p2176_p5 = scmp.ne.s32.totalorder %s2567_s3, %s2175_s10  ;;  %p2179_p6 = scmp.lt.u32.totalorder %s2175_s10, %s2567_s3 }
 0x19a   :  { %p2181_p7 = pnand %p2179_p6, %p2176_p5 }
 0x19c   :  { %2184 = shalt.err (!%p2181_p7)
}
 0x19d   :  { %s2189_s15 = smov 64   ;;  %s2190_s16 = smov 4  }
 0x19e   :  { %1610 = dma.vmem_to_hbm [thread:$0]  %s1605_s2, 4096, %s2567_s3, [#allocation4], %s2189_s15, %s2189_s15, %s2190_s16  }
 0x19f   :  { %2185 = dma.done.wait [#allocation4], 4096  }
 0x1a0   :  { %2186 = vsyncadd [#allocation4], 4294963200 }
 0x1a1   :  { %1614 = vsyncpa [#allocation4], 1 }

</bundles_post_ra>
